<compile_context>
chip_gen: v7x
topology: tpu7x:2x2x1
jax: 0.10.0
libtpu: 0.0.40
codegen_flags: <defaults>
</compile_context>

<pallas_src>
import functools

import jax
import jax.numpy as jnp
from jax.experimental import pallas as pl
from jax.experimental.pallas import tpu as pltpu


def _round_up(a, b):
    return ((a + b - 1) // b) * b


def dkd_kernel(x_ref, t_ref, lbl_ref, out_ref, *, alpha, beta):
    x = x_ref[...].astype(jnp.float32)        # student logits  [tn, Cp]
    t = t_ref[...].astype(jnp.float32)        # teacher logits  [tn, Cp]
    lbl = lbl_ref[...]                        # labels          [tn, 1] int32
    tn, c = x.shape

    # one-hot target mask as a boolean compare (no f32 mask materialization)
    col = jax.lax.broadcasted_iota(jnp.int32, (tn, c), 1)
    is_tgt = col == lbl                                           # [tn, c]

    # ---- single stable exp per input, reused by TCKD and NCKD --------------
    tmax = jnp.max(t, axis=1, keepdims=True)
    xmax = jnp.max(x, axis=1, keepdims=True)
    te = jnp.exp(t - tmax)                                        # [tn, c]
    xe = jnp.exp(x - xmax)                                        # [tn, c]

    sum_te = jnp.sum(te, axis=1, keepdims=True)                   # [tn, 1]
    sum_xe = jnp.sum(xe, axis=1, keepdims=True)

    te_tgt = jnp.sum(jnp.where(is_tgt, te, 0.0), axis=1, keepdims=True)
    xe_tgt = jnp.sum(jnp.where(is_tgt, xe, 0.0), axis=1, keepdims=True)

    # ---- TCKD: binary target / non-target KL (per-row scalars only) --------
    # p_t = softmax(t)[target]  (== exp(t_tgt)/sum(exp(t)), now stabilized)
    p_t = jnp.clip(te_tgt * pl.reciprocal(sum_te, approx=True), 0.0, 1.0)
    q_t = jnp.clip(xe_tgt * pl.reciprocal(sum_xe, approx=True), 0.0, 1.0)

    b1 = p_t + 1e-6
    b2 = (1.0 - p_t) + 1e-6
    d1 = q_t + 1e-6
    d2 = (1.0 - q_t) + 1e-6
    tckd = b1 * jnp.log(b1 / d1) + b2 * jnp.log(b2 / d2)          # [tn, 1]

    # ---- NCKD: KL over non-target classes, in log space --------------------
    # p_hat_j = exp(t_j - tmax) / sum_{non-target} exp(t - tmax)
    # log p_hat_j - log q_hat_j = (t_j - x_j) + c_row        (per-row constant)
    te_nt = jnp.where(is_tgt, 0.0, te)
    te_nt_sum = jnp.sum(te_nt, axis=1, keepdims=True)             # [tn, 1]
    xe_nt_sum = jnp.sum(jnp.where(is_tgt, 0.0, xe), axis=1, keepdims=True)

    p_hat = te_nt * pl.reciprocal(te_nt_sum, approx=True)         # 0 on target
    c_row = (xmax - tmax) + (jnp.log(xe_nt_sum) - jnp.log(te_nt_sum))
    # target column: p_hat == 0 -> contributes exactly 0 (matches torch, where
    # the 1e-6 epsilon on both sides gives 1e-6 * log(1) == 0).
    nckd = jnp.sum(p_hat * ((t - x) + c_row), axis=1, keepdims=True)  # [tn, 1]

    out_ref[...] = alpha * tckd + beta * nckd                     # [tn, 1]


def dkd_loss(input_logits, target_logits, true_labels,
             alpha=1.0, beta=1.0, max_tile_n=512):
    N, C = input_logits.shape

    # lane-dense class axis: pad C up to a multiple of 128 with very negative
    # logits (exp underflows to 0, so they contribute nothing).
    c_p = _round_up(C, 128)

    # tile size from a VMEM budget (2 inputs x 2 pipeline buffers x 4 B/elem),
    # so the same code works on v5e / v6e / v7x VMEM sizes.
    budget_bytes = 8 * 1024 * 1024
    tile_cap = max(8, (budget_bytes // (16 * c_p)) // 8 * 8)
    tile_n = min(512, tile_cap, _round_up(N, 8), int(max_tile_n))
    tile_n = max(8, (tile_n // 8) * 8)

    n_p = _round_up(N, tile_n)
    grid_n = n_p // tile_n

    pad_n, pad_c = n_p - N, c_p - C
    x_p = jnp.pad(input_logits, ((0, pad_n), (0, pad_c)), constant_values=-1e9)
    t_p = jnp.pad(target_logits, ((0, pad_n), (0, pad_c)), constant_values=-1e9)
    lbl_p = jnp.pad(true_labels.reshape(N).astype(jnp.int32),
                    (0, pad_n)).reshape(n_p, 1)

    kernel = functools.partial(dkd_kernel, alpha=float(alpha), beta=float(beta))
    per_row = pl.pallas_call(
        kernel,
        grid=(grid_n,),
        out_shape=jax.ShapeDtypeStruct((n_p, 1), jnp.float32),
        in_specs=[
            pl.BlockSpec((tile_n, c_p), lambda i: (i, 0)),
            pl.BlockSpec((tile_n, c_p), lambda i: (i, 0)),
            pl.BlockSpec((tile_n, 1), lambda i: (i, 0)),
        ],
        out_specs=pl.BlockSpec((tile_n, 1), lambda i: (i, 0)),
        compiler_params=pltpu.CompilerParams(
            dimension_semantics=("parallel",),
            vmem_limit_bytes=32 * 1024 * 1024,
        ),
    )(x_p, t_p, lbl_p)

    # tiny final reduction over the valid rows only (padded rows dropped).
    return jnp.sum(per_row[:N, 0]) / jnp.float32(N)


def _reference(input_logits, target_logits, true_labels, alpha=1.0, beta=1.0):
    # pure-JAX mirror of the PyTorch module (for self-check)
    x = input_logits.astype(jnp.float32)
    t = target_logits.astype(jnp.float32)
    C = x.shape[1]
    mask = jax.nn.one_hot(true_labels, C, dtype=jnp.float32)
    p_t = jnp.exp(jnp.sum(t * mask, 1, keepdims=True)) / jnp.sum(jnp.exp(t), 1, keepdims=True)
    q_t = jnp.exp(jnp.sum(x * mask, 1, keepdims=True)) / jnp.sum(jnp.exp(x), 1, keepdims=True)
    b = jnp.concatenate([p_t, 1 - p_t], 1) + 1e-6
    d = jnp.concatenate([q_t, 1 - q_t], 1) + 1e-6
    tckd = jnp.sum(b * jnp.log(b / d), 1)
    p_hat = jax.nn.softmax(t - 1000.0 * mask, 1) + 1e-6 * mask
    q_hat = jax.nn.softmax(x - 1000.0 * mask, 1) + 1e-6 * mask
    nckd = jnp.sum(p_hat * jnp.log(p_hat / q_hat), 1)
    return jnp.mean(alpha * tckd + beta * nckd)


if __name__ == "__main__":
    key = jax.random.PRNGKey(0)
    k1, k2, k3 = jax.random.split(key, 3)

    # Case 1: small single-tile problem (C padded 32 -> 128 internally).
    N, C = 8, 32
    x = jax.random.normal(k1, (N, C), dtype=jnp.float32)
    t = jax.random.normal(k2, (N, C), dtype=jnp.float32)
    y = jax.random.randint(k3, (N,), 0, C, dtype=jnp.int32)
    loss = jax.block_until_ready(dkd_loss(x, t, y, alpha=1.0, beta=2.0))
    ref = _reference(x, t, y, 1.0, 2.0)
    assert jnp.allclose(loss, ref, rtol=5e-3, atol=5e-4), (loss, ref)

    # Case 2: multi-tile grid with row + class padding (N 40->48, C 40->128).
    k4, k5, k6 = jax.random.split(k1, 3)
    N2, C2 = 40, 40
    x2 = jax.random.normal(k4, (N2, C2), dtype=jnp.float32)
    t2 = jax.random.normal(k5, (N2, C2), dtype=jnp.float32)
    y2 = jax.random.randint(k6, (N2,), 0, C2, dtype=jnp.int32)
    loss2 = jax.block_until_ready(
        dkd_loss(x2, t2, y2, alpha=1.5, beta=0.5, max_tile_n=16))
    ref2 = _reference(x2, t2, y2, 1.5, 0.5)
    assert jnp.allclose(loss2, ref2, rtol=5e-3, atol=5e-4), (loss2, ref2)

    print("KERNEL_OK")
</pallas_src>

<mosaic_0001>
module attributes {stable_mosaic.version = 11 : i64} {
  func.func @dkd_kernel(%arg0: i32, %arg1: memref<8x128xf32, #tpu.memory_space<vmem>>, %arg2: memref<8x128xf32, #tpu.memory_space<vmem>>, %arg3: memref<8x1xi32, #tpu.memory_space<vmem>>, %arg4: memref<8x1xf32, #tpu.memory_space<vmem>>) attributes {dimension_semantics = [#tpu.dimension_semantics<parallel>], iteration_bounds = array<i64: 1>, scalar_prefetch = 0 : i64, scratch_operands = 0 : i64, tpu.core_type = #tpu.core_type<tc>, window_params = [{transform_indices = @transform_0, window_bounds = array<i64: 8, 128>}, {transform_indices = @transform_1, window_bounds = array<i64: 8, 128>}, {transform_indices = @transform_2, window_bounds = array<i64: 8, 1>}, {transform_indices = @transform_3, window_bounds = array<i64: 8, 1>}]} {
    %c0 = arith.constant 0 : index
    %c0_0 = arith.constant 0 : index
    %0 = vector.load %arg1[%c0, %c0_0] : memref<8x128xf32, #tpu.memory_space<vmem>>, vector<8x128xf32>
    %c0_1 = arith.constant 0 : index
    %c0_2 = arith.constant 0 : index
    %1 = vector.load %arg2[%c0_1, %c0_2] : memref<8x128xf32, #tpu.memory_space<vmem>>, vector<8x128xf32>
    %c0_3 = arith.constant 0 : index
    %c0_4 = arith.constant 0 : index
    %2 = vector.load %arg3[%c0_3, %c0_4] : memref<8x1xi32, #tpu.memory_space<vmem>>, vector<8x1xi32>
    %3 = tpu.iota {dimensions = array<i32: 1>} : vector<8x128xi32>
    %4 = vector.broadcast %2 : vector<8x1xi32> to vector<8x128xi32>
    %5 = arith.cmpi eq, %3, %4 : vector<8x128xi32>
    %cst = arith.constant dense<0xFF800000> : vector<8xf32>
    %6 = vector.multi_reduction <maximumf>, %1, %cst [1] : vector<8x128xf32> to vector<8xf32>
    %7 = vector.shape_cast %6 : vector<8xf32> to vector<8x1xf32>
    %cst_5 = arith.constant dense<0xFF800000> : vector<8xf32>
    %8 = vector.multi_reduction <maximumf>, %0, %cst_5 [1] : vector<8x128xf32> to vector<8xf32>
    %9 = vector.shape_cast %8 : vector<8xf32> to vector<8x1xf32>
    %10 = vector.broadcast %7 : vector<8x1xf32> to vector<8x128xf32>
    %11 = arith.subf %1, %10 : vector<8x128xf32>
    %12 = math.exp %11 : vector<8x128xf32>
    %13 = vector.broadcast %9 : vector<8x1xf32> to vector<8x128xf32>
    %14 = arith.subf %0, %13 : vector<8x128xf32>
    %15 = math.exp %14 : vector<8x128xf32>
    %cst_6 = arith.constant dense<0.000000e+00> : vector<8xf32>
    %16 = vector.multi_reduction <add>, %12, %cst_6 [1] : vector<8x128xf32> to vector<8xf32>
    %17 = vector.shape_cast %16 : vector<8xf32> to vector<8x1xf32>
    %cst_7 = arith.constant dense<0.000000e+00> : vector<8xf32>
    %18 = vector.multi_reduction <add>, %15, %cst_7 [1] : vector<8x128xf32> to vector<8xf32>
    %19 = vector.shape_cast %18 : vector<8xf32> to vector<8x1xf32>
    %cst_8 = arith.constant 0.000000e+00 : f32
    %20 = vector.broadcast %cst_8 : f32 to vector<8x128xf32>
    %21 = arith.select %5, %12, %20 : vector<8x128xi1>, vector<8x128xf32>
    %cst_9 = arith.constant dense<0.000000e+00> : vector<8xf32>
    %22 = vector.multi_reduction <add>, %21, %cst_9 [1] : vector<8x128xf32> to vector<8xf32>
    %23 = vector.shape_cast %22 : vector<8xf32> to vector<8x1xf32>
    %cst_10 = arith.constant 0.000000e+00 : f32
    %24 = vector.broadcast %cst_10 : f32 to vector<8x128xf32>
    %25 = arith.select %5, %15, %24 : vector<8x128xi1>, vector<8x128xf32>
    %cst_11 = arith.constant dense<0.000000e+00> : vector<8xf32>
    %26 = vector.multi_reduction <add>, %25, %cst_11 [1] : vector<8x128xf32> to vector<8xf32>
    %27 = vector.shape_cast %26 : vector<8xf32> to vector<8x1xf32>
    %28 = tpu.reciprocal %17 {approx = true} : vector<8x1xf32> -> vector<8x1xf32>
    %29 = arith.mulf %23, %28 : vector<8x1xf32>
    %cst_12 = arith.constant 0.000000e+00 : f32
    %cst_13 = arith.constant 1.000000e+00 : f32
    %30 = vector.broadcast %cst_12 : f32 to vector<8x1xf32>
    %31 = arith.maximumf %30, %29 : vector<8x1xf32>
    %32 = vector.broadcast %cst_13 : f32 to vector<8x1xf32>
    %33 = arith.minimumf %32, %31 : vector<8x1xf32>
    %34 = tpu.reciprocal %19 {approx = true} : vector<8x1xf32> -> vector<8x1xf32>
    %35 = arith.mulf %27, %34 : vector<8x1xf32>
    %cst_14 = arith.constant 0.000000e+00 : f32
    %cst_15 = arith.constant 1.000000e+00 : f32
    %36 = vector.broadcast %cst_14 : f32 to vector<8x1xf32>
    %37 = arith.maximumf %36, %35 : vector<8x1xf32>
    %38 = vector.broadcast %cst_15 : f32 to vector<8x1xf32>
    %39 = arith.minimumf %38, %37 : vector<8x1xf32>
    %cst_16 = arith.constant 9.99999997E-7 : f32
    %40 = vector.broadcast %cst_16 : f32 to vector<8x1xf32>
    %41 = arith.addf %33, %40 : vector<8x1xf32>
    %cst_17 = arith.constant 1.000000e+00 : f32
    %42 = vector.broadcast %cst_17 : f32 to vector<8x1xf32>
    %43 = arith.subf %42, %33 : vector<8x1xf32>
    %cst_18 = arith.constant 9.99999997E-7 : f32
    %44 = vector.broadcast %cst_18 : f32 to vector<8x1xf32>
    %45 = arith.addf %43, %44 : vector<8x1xf32>
    %cst_19 = arith.constant 9.99999997E-7 : f32
    %46 = vector.broadcast %cst_19 : f32 to vector<8x1xf32>
    %47 = arith.addf %39, %46 : vector<8x1xf32>
    %cst_20 = arith.constant 1.000000e+00 : f32
    %48 = vector.broadcast %cst_20 : f32 to vector<8x1xf32>
    %49 = arith.subf %48, %39 : vector<8x1xf32>
    %cst_21 = arith.constant 9.99999997E-7 : f32
    %50 = vector.broadcast %cst_21 : f32 to vector<8x1xf32>
    %51 = arith.addf %49, %50 : vector<8x1xf32>
    %52 = arith.divf %41, %47 : vector<8x1xf32>
    %53 = math.log %52 : vector<8x1xf32>
    %54 = arith.mulf %41, %53 : vector<8x1xf32>
    %55 = arith.divf %45, %51 : vector<8x1xf32>
    %56 = math.log %55 : vector<8x1xf32>
    %57 = arith.mulf %45, %56 : vector<8x1xf32>
    %58 = arith.addf %54, %57 : vector<8x1xf32>
    %cst_22 = arith.constant 0.000000e+00 : f32
    %59 = vector.broadcast %cst_22 : f32 to vector<8x128xf32>
    %60 = arith.select %5, %59, %12 : vector<8x128xi1>, vector<8x128xf32>
    %cst_23 = arith.constant dense<0.000000e+00> : vector<8xf32>
    %61 = vector.multi_reduction <add>, %60, %cst_23 [1] : vector<8x128xf32> to vector<8xf32>
    %62 = vector.shape_cast %61 : vector<8xf32> to vector<8x1xf32>
    %cst_24 = arith.constant 0.000000e+00 : f32
    %63 = vector.broadcast %cst_24 : f32 to vector<8x128xf32>
    %64 = arith.select %5, %63, %15 : vector<8x128xi1>, vector<8x128xf32>
    %cst_25 = arith.constant dense<0.000000e+00> : vector<8xf32>
    %65 = vector.multi_reduction <add>, %64, %cst_25 [1] : vector<8x128xf32> to vector<8xf32>
    %66 = vector.shape_cast %65 : vector<8xf32> to vector<8x1xf32>
    %67 = tpu.reciprocal %62 {approx = true} : vector<8x1xf32> -> vector<8x1xf32>
    %68 = vector.broadcast %67 : vector<8x1xf32> to vector<8x128xf32>
    %69 = arith.mulf %60, %68 : vector<8x128xf32>
    %70 = arith.subf %9, %7 : vector<8x1xf32>
    %71 = math.log %66 : vector<8x1xf32>
    %72 = math.log %62 : vector<8x1xf32>
    %73 = arith.subf %71, %72 : vector<8x1xf32>
    %74 = arith.addf %70, %73 : vector<8x1xf32>
    %75 = arith.subf %1, %0 : vector<8x128xf32>
    %76 = vector.broadcast %74 : vector<8x1xf32> to vector<8x128xf32>
    %77 = arith.addf %75, %76 : vector<8x128xf32>
    %78 = arith.mulf %69, %77 : vector<8x128xf32>
    %cst_26 = arith.constant dense<0.000000e+00> : vector<8xf32>
    %79 = vector.multi_reduction <add>, %78, %cst_26 [1] : vector<8x128xf32> to vector<8xf32>
    %80 = vector.shape_cast %79 : vector<8xf32> to vector<8x1xf32>
    %cst_27 = arith.constant 1.000000e+00 : f32
    %81 = vector.broadcast %cst_27 : f32 to vector<8x1xf32>
    %82 = arith.mulf %81, %58 : vector<8x1xf32>
    %cst_28 = arith.constant 2.000000e+00 : f32
    %83 = vector.broadcast %cst_28 : f32 to vector<8x1xf32>
    %84 = arith.mulf %83, %80 : vector<8x1xf32>
    %85 = arith.addf %82, %84 : vector<8x1xf32>
    %c0_29 = arith.constant 0 : index
    %c0_30 = arith.constant 0 : index
    %86 = vector.load %arg4[%c0_29, %c0_30] : memref<8x1xf32, #tpu.memory_space<vmem>>, vector<8x1xf32>
    tpu.vector_store %arg4[%c0_29, %c0_30], %85 {strides = array<i32>} : memref<8x1xf32, #tpu.memory_space<vmem>>, vector<8x1xf32>,
    return
  }
  func.func @transform_0(%arg0: i32) -> (i32, i32) {
    %c0_i32 = arith.constant 0 : i32
    %c0_i32_0 = arith.constant 0 : i32
    return %arg0, %c0_i32 : i32, i32
  }
  func.func @transform_1(%arg0: i32) -> (i32, i32) {
    %c0_i32 = arith.constant 0 : i32
    %c0_i32_0 = arith.constant 0 : i32
    return %arg0, %c0_i32 : i32, i32
  }
  func.func @transform_2(%arg0: i32) -> (i32, i32) {
    %c0_i32 = arith.constant 0 : i32
    %c0_i32_0 = arith.constant 0 : i32
    return %arg0, %c0_i32 : i32, i32
  }
  func.func @transform_3(%arg0: i32) -> (i32, i32) {
    %c0_i32 = arith.constant 0 : i32
    %c0_i32_0 = arith.constant 0 : i32
    return %arg0, %c0_i32 : i32, i32
  }
}

</mosaic_0001>

<bundles_post_ra>
// kernel: tpu_custom_call.1
= control target key start
LH: loop header
LB: loop body
LE: loop exit
PB: predicated region body
PF: predicated region fallthrough
CT: control target
= control target key end

     0   :  { %8 = vsyncpa [#allocation3], 0  ;;  %s159_s12 = smov [#allocation2]   ;;  %s202_s0 = inlined_call_operand.vmem [shape: f32[8,128], index: 0, kind: input, shape index: {}]   ;;  %s203_s1 = inlined_call_operand.hbm [shape: f32[8,128], index: 1, kind: input, shape index: {}]   ;;  %s204_s2 = inlined_call_operand.vmem [shape: s32[8,1], index: 2, kind: input, shape index: {}]   ;;  %s205_s3 = inlined_call_operand.vmem [shape: f32[8,1], index: 3, kind: output, shape index: {}]  }
   0x1   :  { %s17_s13 = sshll.u32 %s159_s12, 4  ;;  %s135_s16 = scalar_lea.hbm %s203_s1, 128  ;;  %s18_s13 = int_to_ptr.vmem [resolvable:$true] %s17_s13 }
   0x2   :  { %p136_p0 = scmp.ne.s32.totalorder %s203_s1, %s135_s16  ;;  %p139_p1 = scmp.lt.u32.totalorder %s135_s16, %s203_s1 }
   0x4   :  { %p141_p2 = pnand %p139_p1, %p136_p0 }
   0x6   :  { %144 = shalt.err (!%p141_p2)
}
   0x7   :  { %s145_s21 = scalar_lea.vmem %s18_s13, 128  ;;  %p150_p4 = scmp.lt.s32.totalorder %s18_s13, %s18_s13 }
   0x8   :  { %p146_p3 = scmp.ne.s32.totalorder %s18_s13, %s145_s21  ;;  %p151_p5 = scmp.lt.s32.totalorder %s145_s21, %s145_s21 }
   0xa   :  { %p152_p6 = por %p151_p5, %p150_p4 }
   0xc   :  { %p153_p7 = pnand %p152_p6, %p146_p3 }
   0xe   :  { %156 = shalt.err (!%p153_p7)
}
   0xf   :  { %20 = dma.hbm_to_vmem [thread:$0]  %s203_s1, 128, %s18_s13, [#allocation3]  }
  0x10   :  { %157 = dma.done.wait [#allocation3], 128  }
  0x11   :  { %158 = vsyncadd [#allocation3], 4294967168  ;;  %v160_v0 = vmov 0   ;;  %v27_v1 = vld [vmem:[#allocation2] sm:$0xff]  ;;  %v29_v9 = vlaneseq  ;;  %vm102_vm1 = vcmask 7168  }
  0x12   :  { %111 = vset.pattern.permute.xlu1 %v160_v0  ;;  %112 = vset.pattern.permute.xlu0 %v160_v0  ;;  %v28_v2 = vld [vmem:[%s204_s2] sm:$0xff] }
  0x13   :  { %35 = vmax.xlane.f32.xlu0 %v27_v1  ;;  %32 = vperm.xlu1 %111, %v28_v2   ;;  %v26_v3 = vld [vmem:[%s202_s0] sm:$0xff]  ;;  %v30_v11 = vand.u32 127, %v29_v9 }
  0x14   :  { %v95_v25 = vsub.f32 %v27_v1, %v26_v3 }
  0x17   :  { %37 = vmax.xlane.f32.xlu0 %v26_v3 }
  0x92   :  { %v33_v12 = vpop.permute.xlu1 %32 }
  0x93   :  { %vm34_vm0 = vcmp.eq.s32.totalorder %v30_v11, %v33_v12 }
  0xa0   :  { %v36_v4 = vpop.xlane.xlu0 %35 }
  0xa1   :  { %v39_v5 = vsub.f32 %v27_v1, %v36_v4 }
  0xa3   :  { %v40_v6 = vmul.f32 1.442695, %v39_v5 }
  0xa4   :  { %v38_v7 = vpop.xlane.xlu0 %37 }
  0xa5   :  { %113 = vpow2.f32 %v40_v6  ;;  %v42_v8 = vsub.f32 %v26_v3, %v38_v7  ;;  %v88_v26 = vsub.f32 %v38_v7, %v36_v4 }
  0xa7   :  { %v43_v10 = vmul.f32 1.442695, %v42_v8 }
  0xa9   :  { %115 = vpow2.f32 %v43_v10 }
  0xaf   :  { %v114_v13 = vpop.eup %113 }
  0xb0   :  { %v80_v14 = vsel %vm34_vm0, 0.0, %v114_v13  ;;  %v49_v18 = vsel %vm34_vm0, %v114_v13, 0.0 }
  0xb1   :  { %81 = vadd.xlane.f32.xlu1 %v80_v14 }
  0xb3   :  { %v116_v15 = vpop.eup %115 }
  0xb4   :  { %v83_v16 = vsel %vm34_vm0, 0.0, %v116_v15  ;;  %v52_v17 = vsel %vm34_vm0, %v116_v15, 0.0 }
  0xb5   :  { %84 = vadd.xlane.f32.xlu0 %v83_v16 }
  0xb9   :  { %47 = vadd.xlane.f32.xlu0 %v116_v15 }
  0xbd   :  { %45 = vadd.xlane.f32.xlu0 %v114_v13 }
  0xc1   :  { %53 = vadd.xlane.f32.xlu0 %v52_v17 }
  0xc5   :  { %50 = vadd.xlane.f32.xlu0 %v49_v18 }
 0x13e   :  { %v82_v19 = vpop.xlane.xlu1 %81 }
 0x13f   :  { %117 = vlog2.f32 %v82_v19 }
 0x142   :  { %v85_v20 = vpop.xlane.xlu0 %84 }
 0x143   :  { %119 = vlog2.f32 %v85_v20 }
 0x144   :  { %121 = vrcp.f32 %v82_v19 }
 0x146   :  { %v48_v33 = vpop.xlane.xlu0 %47 }
 0x147   :  { %123 = vrcp.f32 %v48_v33 }
 0x149   :  { %v118_v21 = vpop.eup %117 }
 0x14a   :  { %v92_v23 = vmul.f32 0.6931472, %v118_v21  ;;  %v46_v34 = vpop.xlane.xlu0 %45 }
 0x14b   :  { %125 = vrcp.f32 %v46_v34 }
 0x14d   :  { %v120_v22 = vpop.eup %119 }
 0x14e   :  { %v90_v24 = vmul.f32 0.6931472, %v120_v22  ;;  %v122_v28 = vpop.eup %121  ;;  %v54_v36 = vpop.xlane.xlu0 %53 }
 0x14f   :  { %v87_v30 = vmul.f32 %v122_v28, %v80_v14 }
 0x150   :  { %v93_v27 = vsub.f32 %v90_v24, %v92_v23 }
 0x151   :  { %v124_v35 = vpop.eup %123 }
 0x152   :  { %v94_v29 = vadd.f32 %v93_v27, %v88_v26  ;;  %v60_v37 = vmul.f32 %v124_v35, %v54_v36  ;;  %v51_v42 = vpop.xlane.xlu0 %50 }
 0x154   :  { %v96_v31 = vadd.f32 %v95_v25, %v94_v29  ;;  %v61_v38 = vmax.f32 %v60_v37, 0.0 }
 0x155   :  { %v126_v40 = vpop.eup %125 }
 0x156   :  { %v97_v32 = vmul.f32 %v96_v31, %v87_v30  ;;  %v62_v39 = vmin.f32 %v61_v38, 1.0  ;;  %v56_v43 = vmul.f32 %v126_v40, %v51_v42 }
 0x158   :  { %98 = vadd.xlane.f32.xlu0 %v97_v32  ;;  %v67_v41 = vsub.f32 1.0, %v62_v39  ;;  %v66_v45 = vadd.f32 1e-06, %v62_v39  ;;  %v57_v46 = vmax.f32 %v56_v43, 0.0 }
 0x15a   :  { %v68_v44 = vadd.f32 1e-06, %v67_v41  ;;  %v58_v47 = vmin.f32 %v57_v46, 1.0 }
 0x15c   :  { %127 = vrcp.f32 %v68_v44  ;;  %v64_v48 = vsub.f32 1.0, %v58_v47  ;;  %v63_v52 = vadd.f32 1e-06, %v58_v47 }
 0x15d   :  { %129 = vrcp.f32 %v66_v45 }
 0x15e   :  { %v65_v50 = vadd.f32 1e-06, %v64_v48 }
 0x166   :  { %v128_v49 = vpop.eup %127 }
 0x167   :  { %v130_v51 = vpop.eup %129  ;;  %v75_v53 = vmul.f32 %v128_v49, %v65_v50 }
 0x168   :  { %v70_v54 = vmul.f32 %v130_v51, %v63_v52 }
 0x169   :  { %131 = vlog2.f32 %v75_v53 }
 0x16a   :  { %133 = vlog2.f32 %v70_v54 }
 0x173   :  { %v132_v55 = vpop.eup %131 }
 0x174   :  { %v134_v56 = vpop.eup %133  ;;  %v77_v57 = vmul.f32 0.6931472, %v132_v55 }
 0x175   :  { %v72_v58 = vmul.f32 0.6931472, %v134_v56 }
 0x176   :  { %v78_v59 = vmul.f32 %v77_v57, %v65_v50 }
 0x177   :  { %v73_v60 = vmul.f32 %v72_v58, %v63_v52 }
 0x179   :  { %v79_v62 = vadd.f32 %v78_v59, %v73_v60 }
 0x1e5   :  { %v99_v61 = vpop.xlane.xlu0 %98 }
 0x1e6   :  { %v100_v63 = vmul.f32 2.0, %v99_v61 }
 0x1e8   :  { %v101_v0 = vadd.f32 %v100_v63, %v79_v62 }
 0x1ea   :  { %103 = vst.msk [vmem:[%s205_s3] sm:$0xff] %vm102_vm1, %v101_v0 }
 0x1eb   :  { %108 = vsyncpa [#allocation3], 1 }

</bundles_post_ra>
